<compile_context>
chip_gen: v6e
topology: v6e:2x2x1
jax: 0.10.0
libtpu: 0.0.40
codegen_flags: <defaults>
</compile_context>

<pallas_src>
import math

import jax
import jax.numpy as jnp
from jax.experimental import pallas as pl
from jax.experimental.pallas import tpu as pltpu


def _round_up(x, m):
    return ((x + m - 1) // m) * m


def _round_down(x, m):
    return max(m, (x // m) * m)


def _vmem_tile_budget_bytes():
    """Conservative per-step VMEM budget for streaming tiles.

    Uses ~1/8 of physical VMEM so double-buffered tiles + compiler scratch fit
    comfortably on every generation (v5e/v6e: 128 MiB, v7x: 64 MiB per TC).
    """
    cap = 64 * 1024 * 1024  # assume the smallest (v7x per-TC) if the query fails
    try:
        cap = int(getattr(pltpu.get_tpu_info(), "vmem_capacity_bytes", cap))
    except Exception:
        pass
    return max(cap // 8, 4 * 1024 * 1024)


# ---------------------------------------------------------------------------
# Kernels
# ---------------------------------------------------------------------------

def _melora_merged_kernel(x_ref, w_ref, o_ref):
    """Inference path: one lane-dense MXU pass per (row-tile, group).

    x_ref : (TN, f_in)    bf16 group slice of x
    w_ref : (f_in, f_out) bf16 pre-merged  scaling_g * (A_g @ B_g)
    o_ref : (TN, f_out)   output tile (group g columns)
    """
    acc = jnp.dot(x_ref[...], w_ref[...], preferred_element_type=jnp.float32)
    o_ref[...] = acc.astype(o_ref.dtype)


def _melora_two_dot_kernel(x_ref, a_ref, b_ref, o_ref):
    """Training-style path: A and B kept separate (scaling pre-folded into B).

    x_ref : (TN, f_in)   bf16
    a_ref : (f_in, R)    bf16 (rank zero-padded to a multiple of 8)
    b_ref : (R, f_out)   bf16, already multiplied by alpha_g / rank_g
    o_ref : (TN, f_out)
    """
    xa = jnp.dot(x_ref[...], a_ref[...], preferred_element_type=jnp.float32)
    y = jnp.dot(xa.astype(b_ref.dtype), b_ref[...],
                preferred_element_type=jnp.float32)
    o_ref[...] = y.astype(o_ref.dtype)


# ---------------------------------------------------------------------------
# Wrapper
# ---------------------------------------------------------------------------

def melora_forward(x, As, Bs, scalings, *, merge_weights=True,
                   compute_dtype=jnp.bfloat16, row_tile=None):
    """Pallas forward of MELoRALayer.

    out[:, g*f_out:(g+1)*f_out] = x[:, g*f_in:(g+1)*f_in] @ A_g @ B_g * scaling_g
    """
    l_num = len(As)
    N, in_dim = x.shape
    f_in = As[0].shape[0]
    f_out = Bs[0].shape[1]
    out_dim = f_out * l_num
    assert in_dim == f_in * l_num, "in_dim must equal l_num * f_in"
    # (8, 128) BlockSpec rule: per-group feature widths must be lane-aligned so
    # output stores are unmasked (lane-dense) and lowering succeeds.
    assert f_in % 128 == 0 and f_out % 128 == 0, (
        f"per-group dims must be multiples of 128 (f_in={f_in}, f_out={f_out})")
    # TODO(synk): support non-128-aligned group widths by padding per-group features.
    # TODO(synk): training-mode dropout (p > 0) is not implemented in the kernel.

    out_dtype = x.dtype
    cmp_bytes = jnp.dtype(compute_dtype).itemsize
    out_bytes = jnp.dtype(out_dtype).itemsize

    # --- parameter prep (tiny; in real serving do this once and cache) --------
    if merge_weights:
        W = jnp.stack([(a.astype(jnp.float32) @ b.astype(jnp.float32)) * s
                       for a, b, s in zip(As, Bs, scalings)])
        W = W.astype(compute_dtype)                        # (l_num, f_in, f_out)
        fixed_bytes = 2 * f_in * f_out * cmp_bytes         # double-buffered W_g
    else:
        max_rank = max(a.shape[1] for a in As)
        rank_p = _round_up(max_rank, 8)                    # sublane-friendly pad
        A_stk = jnp.stack([jnp.pad(a.astype(jnp.float32),
                                   ((0, 0), (0, rank_p - a.shape[1])))
                           for a in As]).astype(compute_dtype)
        # Fold scaling into B at prep time (no per-tile VPU multiply / SMEM arg).
        B_stk = jnp.stack([jnp.pad(b.astype(jnp.float32) * s,
                                   ((0, rank_p - b.shape[0]), (0, 0)))
                           for b, s in zip(Bs, scalings)]).astype(compute_dtype)
        fixed_bytes = 2 * (f_in * rank_p + rank_p * f_out) * cmp_bytes

    # --- row tiling: stream x/out in (TN, f) tiles; group weights stay resident
    per_row_bytes = (2 * f_in * cmp_bytes       # double-buffered x tile
                     + 2 * f_out * out_bytes    # double-buffered out tile
                     + f_out * 4)               # f32 accumulator
    budget = _vmem_tile_budget_bytes()
    tn_cap = max(8, (budget - fixed_bytes) // per_row_bytes)
    if row_tile is None:
        row_tile = min(1024, tn_cap)
    TN = int(min(_round_up(N, 8), _round_down(int(row_tile), 8)))
    N_pad = _round_up(N, TN)
    n_tiles = N_pad // TN

    xp = x if N_pad == N else jnp.pad(x, ((0, N_pad - N), (0, 0)))
    xp = xp.astype(compute_dtype)

    est_bytes = fixed_bytes + TN * per_row_bytes
    cparams = pltpu.CompilerParams(
        # Both axes are fully independent; lets v7x's two TCs shard the grid.
        dimension_semantics=("parallel", "parallel"),
        vmem_limit_bytes=int(min(max(4 * est_bytes, 16 << 20), 32 << 20)),
    )

    # Group OUTERMOST -> W_g / A_g / B_g are not re-DMA'd across the inner N loop.
    grid = (l_num, n_tiles)
    x_spec = pl.BlockSpec((TN, f_in), lambda g, n: (n, g))
    out_spec = pl.BlockSpec((TN, f_out), lambda g, n: (n, g))
    out_shape = jax.ShapeDtypeStruct((N_pad, out_dim), out_dtype)

    if merge_weights:
        out = pl.pallas_call(
            _melora_merged_kernel,
            out_shape=out_shape,
            grid=grid,
            in_specs=[
                x_spec,
                pl.BlockSpec((pl.Squeezed(), f_in, f_out), lambda g, n: (g, 0, 0)),
            ],
            out_specs=out_spec,
            compiler_params=cparams,
        )(xp, W)
    else:
        out = pl.pallas_call(
            _melora_two_dot_kernel,
            out_shape=out_shape,
            grid=grid,
            in_specs=[
                x_spec,
                pl.BlockSpec((pl.Squeezed(), f_in, rank_p), lambda g, n: (g, 0, 0)),
                pl.BlockSpec((pl.Squeezed(), rank_p, f_out), lambda g, n: (g, 0, 0)),
            ],
            out_specs=out_spec,
            compiler_params=cparams,
        )(xp, A_stk, B_stk)

    return out if N_pad == N else out[:N]


# ---------------------------------------------------------------------------
# Parameter init (mirrors the PyTorch __init__) and pure-JAX reference
# ---------------------------------------------------------------------------

def init_melora_params(key, in_dim, out_dim, ranks, alphas):
    """kaiming_uniform_(a=sqrt(5)) on a 2-D tensor -> U(-1/sqrt(fan_in), 1/sqrt(fan_in))."""
    l_num = len(ranks)
    f_in = in_dim // l_num
    f_out = out_dim // l_num
    alphas = list(alphas) + [1.0] * max(0, len(ranks) - len(alphas))

    As, Bs, scalings = [], [], []
    for i, r in enumerate(ranks):
        key, ka, kb = jax.random.split(key, 3)
        bound_a = 1.0 / math.sqrt(r)       # fan_in of A (f_in, r) is r
        bound_b = 1.0 / math.sqrt(f_out)   # fan_in of B (r, f_out) is f_out
        As.append(jax.random.uniform(ka, (f_in, r), jnp.float32, -bound_a, bound_a))
        Bs.append(jax.random.uniform(kb, (r, f_out), jnp.float32, -bound_b, bound_b))
        scalings.append(alphas[i] / r)
    return As, Bs, scalings


def melora_reference(x, As, Bs, scalings):
    l_num = len(As)
    f_in = As[0].shape[0]
    outs = []
    for i in range(l_num):
        xi = x[:, i * f_in:(i + 1) * f_in]
        outs.append((xi @ As[i] @ Bs[i]) * scalings[i])
    return jnp.concatenate(outs, axis=-1)


if __name__ == "__main__":
    # Small shapes consistent with the module (2-D input (batch, in_dim));
    # per-group feature dims are 128 (lane-aligned).
    N, in_dim, out_dim = 16, 256, 256
    ranks = [4, 8]
    alphas = [1.0, 2.0]

    key = jax.random.PRNGKey(0)
    key, kx = jax.random.split(key)
    x = jax.random.normal(kx, (N, in_dim), jnp.float32)

    As, Bs, scalings = init_melora_params(key, in_dim, out_dim, ranks, alphas)

    ref = melora_reference(x, As, Bs, scalings)

    # Default (inference) path: pre-merged scaling * (A @ B), one matmul / tile.
    out_merged = jax.block_until_ready(
        melora_forward(x, As, Bs, scalings, merge_weights=True))
    # Two-dot path (training-style, A/B kept separate).
    out_twodot = jax.block_until_ready(
        melora_forward(x, As, Bs, scalings, merge_weights=False))

    assert out_merged.shape == (N, out_dim)
    assert out_twodot.shape == (N, out_dim)
    # bf16 MXU operands -> compare against the f32 reference at bf16 tolerance.
    assert jnp.allclose(out_merged, ref, atol=2e-2, rtol=2e-2), "merged path mismatch"
    assert jnp.allclose(out_twodot, ref, atol=2e-2, rtol=2e-2), "two-dot path mismatch"

    print("KERNEL_OK")
</pallas_src>

<mosaic_0001>
module attributes {stable_mosaic.version = 11 : i64} {
  func.func @_melora_merged_kernel(%arg0: i32, %arg1: i32, %arg2: memref<16x128xbf16, #tpu.memory_space<vmem>>, %arg3: memref<1x128x128xbf16, #tpu.memory_space<vmem>>, %arg4: memref<16x128xf32, #tpu.memory_space<vmem>>) attributes {dimension_semantics = [#tpu.dimension_semantics<parallel>, #tpu.dimension_semantics<parallel>], iteration_bounds = array<i64: 2, 1>, scalar_prefetch = 0 : i64, scratch_operands = 0 : i64, tpu.core_type = #tpu.core_type<tc>, window_params = [{transform_indices = @transform_0, window_bounds = array<i64: 16, 128>}, {transform_indices = @transform_1, window_bounds = array<i64: 1, 128, 128>}, {transform_indices = @transform_2, window_bounds = array<i64: 16, 128>}]} {
    %c0 = arith.constant 0 : index
    %c0_0 = arith.constant 0 : index
    %0 = vector.load %arg2[%c0, %c0_0] : memref<16x128xbf16, #tpu.memory_space<vmem>>, vector<16x128xbf16>
    %c0_1 = arith.constant 0 : index
    %c0_2 = arith.constant 0 : index
    %c0_3 = arith.constant 0 : index
    %1 = vector.load %arg3[%c0_1, %c0_2, %c0_3] : memref<1x128x128xbf16, #tpu.memory_space<vmem>>, vector<1x128x128xbf16>
    %2 = vector.shape_cast %1 : vector<1x128x128xbf16> to vector<128x128xbf16>
    %cst = arith.constant dense<0.000000e+00> : vector<16x128xf32>
    %3 = tpu.matmul %0, %2, %cst {dimension_numbers = #tpu.dot_dimension_numbers<[1], [0], [0], [1], [0, 0, 1, 1], [], []>} : vector<16x128xbf16>, vector<128x128xbf16>, vector<16x128xf32> -> vector<16x128xf32>
    %c0_4 = arith.constant 0 : index
    %c0_5 = arith.constant 0 : index
    %4 = vector.load %arg4[%c0_4, %c0_5] : memref<16x128xf32, #tpu.memory_space<vmem>>, vector<16x128xf32>
    tpu.vector_store %arg4[%c0_4, %c0_5], %3 {strides = array<i32>} : memref<16x128xf32, #tpu.memory_space<vmem>>, vector<16x128xf32>,
    return
  }
  func.func @transform_0(%arg0: i32, %arg1: i32) -> (i32, i32) {
    %c0_i32 = arith.constant 0 : i32
    return %arg1, %arg0 : i32, i32
  }
  func.func @transform_1(%arg0: i32, %arg1: i32) -> (i32, i32, i32) {
    %c0_i32 = arith.constant 0 : i32
    %c0_i32_0 = arith.constant 0 : i32
    %c0_i32_1 = arith.constant 0 : i32
    return %arg0, %c0_i32, %c0_i32_0 : i32, i32, i32
  }
  func.func @transform_2(%arg0: i32, %arg1: i32) -> (i32, i32) {
    %c0_i32 = arith.constant 0 : i32
    return %arg1, %arg0 : i32, i32
  }
}

</mosaic_0001>

<bundles_post_ra>
// kernel: tpu_custom_call.1
= control target key start
LH: loop header
LB: loop body
LE: loop exit
PB: predicated region body
PF: predicated region fallthrough
CT: control target
= control target key end

     0   :  { %s953_s0 = inlined_call_operand.hbm [shape: bf16[16,256], index: 0, kind: input, shape index: {}]   ;;  %s954_s1 = inlined_call_operand.hbm [shape: bf16[2,128,128], index: 1, kind: input, shape index: {}]   ;;  %s955_s2 = inlined_call_operand.hbm [shape: f32[16,256], index: 2, kind: output, shape index: {}]  }
   0x1   :  { %956 = sst [smem:[#allocation11_spill]] %s953_s0 }
   0x2   :  { %7 = vsyncpa [#allocation3], 0 }
   0x3   :  { %9 = vsyncpa [#allocation3 + $0x1], 0 }
   0x4   :  { %10 = vsyncpa [#allocation6], 0 }
   0x5   :  { %12 = vsyncpa [#allocation6 + $0x1], 0 }
   0x6   :  { %13 = vsyncpa [#allocation4], 0 }
   0x7   :  { %15 = vsyncpa [#allocation4 + $0x1], 0  ;;  %s770_s9 = smov 0   ;;  %s772_s10 = smov 0  }
   0x8   :  { %s774_s11 = smov 0   ;;  %s776_s12 = smov 0  }
   0x9   :  { %s778_s13 = smov 0   ;;  %s780_s14 = smov 0  }
   0xa LB: > { %s462_s15 = sadd.s32 4294967295, %s742_s14   ;;  %s463_s16 = sadd.s32 4294967294, %s742_s14   ;;  %s742_s14 = sphi %s780_s14, %s21_s14   ;;  %s738_s13 = sphi %s778_s13, %s968_s13   ;;  %s734_s12 = sphi %s776_s12, %s967_s12   ;;  %s730_s11 = sphi %s774_s11, %s966_s11   ;;  %s726_s10 = sphi %s772_s10, %s965_s10   ;;  %s722_s9 = sphi %s770_s9, %s964_s9  }
   0xb   : > { %s33_s17 = sadd.s32 1, %s738_s13  ;;  %s42_s18 = sadd.s32 1, %s730_s11 }
   0xc   : > { %p35_p0 = scmp.ge.s32.totalorder %s33_s17, 2  ;;  %p49_p1 = scmp.ne.s32.totalorder %s730_s11, %s726_s10 }
   0xd   : > { %p50_p2 = scmp.eq.s32.totalorder %s742_s14, 0  ;;  %p55_p3 = scmp.ne.s32.totalorder %s726_s10, %s722_s9 }
   0xe   : > { %s970_s17 = smov (%p35_p0, %s33_s17), 0  ;;  %p56_p5 = scmp.eq.s32.totalorder %s462_s15, 0 }
   0xf   : > { %p811_p4 = por %p50_p2, %p49_p1  ;;  %s38_s20 = ssub.s32 %s738_s13, %s970_s17 }
  0x10   : > { %p107_p6 = scmp.eq.s32.totalorder %s462_s15, 1  ;;  %p40_p7 = scmp.eq.s32.totalorder %s38_s20, 0 }
  0x11   : > { %p817_p8 = por %p56_p5, %p55_p3  ;;  %p113_p10 = scmp.eq.s32.totalorder %s463_s16, 1 }
  0x12   : > { %p821_p9 = por %p107_p6, %p49_p1  ;;  %p465_p12 = scmp.ge.s32.totalorder %s742_s14, 2 }
  0x13   : > { %s826_s23 = scalar_select %p40_p7, %s730_s11, %s42_s18  }
  0x14   : > { %p828_p11 = por %p113_p10, %p55_p3  ;;  %p535_p13 = scmp.lt.s32.totalorder %s742_s14, 2 }
  0x15   : > { %s835_s25 = sand.u32 1, %s730_s11   ;;  %s467_s27 = sshll.u32 %s738_s13, 6 }
  0x16   : > { %s466_s26 = sshll.u32 %s835_s25, 3  ;;  %s961_s0 = sld [smem:[#allocation11_spill]] }
  0x17   : > { %s137_s3 = scalar_lea.vmem [#allocation2], %s466_s26  ;;  %p844_p0 = pnand %p535_p13, %p811_p4 }
  0x18   : > { %s146_s4 = sshll.u32 %s137_s3, 4  ;;  %s134_s6 = scalar_lea.sflag [#allocation3], %s835_s25  ;;  %s147_s4 = int_to_ptr.vmem [resolvable:$true] %s146_s4 }
  0x19   : > { %p604_p1 = pneg %p844_p0  ;;  %s615_s7 = scalar_lea.vmem %s147_s4, 128 }
  0x1a   : > { %p616_p2 = scmp.ne.s32.totalorder %s147_s4, %s615_s7  ;;  %s744_s8 = smov [#allocation2]  }
  0x1b   : > { %s620_s15 = sshll.u32 %s744_s8, 4  ;;  %s621_s15 = int_to_ptr.vmem [resolvable:$false] %s620_s15 }
  0x1c   : > { %s145_s30 = scalar_lea.hbm %s961_s0, %s467_s27  ;;  %p618_p3 = pnand %p616_p2, %p604_p1 }
  0x1d   : > { %s622_s16 = scalar_lea.vmem %s621_s15, 256  ;;  %p623_p6 = scmp.lt.s32.totalorder %s147_s4, %s621_s15 }
  0x1e   : > { %p619_p5 = pneg %p618_p3  ;;  %p624_p4 = scmp.lt.s32.totalorder %s622_s16, %s615_s7 }
  0x20   : > { %p625_p7 = por %p624_p4, %p623_p6 }
  0x22   : > { %p626_p10 = pnand %p625_p7, %p619_p5 }
  0x24   : > { %629 = shalt.err (!%p626_p10)
}
  0x25   : > { %s745_s18 = smov 128   ;;  %s746_s19 = smov 64  }
  0x26   : > { %s747_s20 = smov 4   ;;  %p471_p13 = scmp.ge.s32.totalorder %s742_s14, 1 }
  0x27   : > { %527 = dma.hbm_to_vmem [thread:$0]  (!%p844_p0), %s145_s30, 128, %s147_s4, %s134_s6, %s745_s18, %s746_s19, %s747_s20  }
  0x28   : > { %p175_p2 = scmp.lt.s32.totalorder %s742_s14, 3  ;;  %s468_s26 = sshll.u32 %s835_s25, 6 }
  0x29   : > { %s488_s28 = sshll.u32 %s738_s13, 10  ;;  %s160_s29 = scalar_lea.vmem [#allocation5], %s468_s26 }
  0x2a   : > { %p861_p3 = pnand %p471_p13, %p175_p2  ;;  %s167_s3 = sshll.u32 %s160_s29, 4  ;;  %s168_s3 = int_to_ptr.vmem [resolvable:$true] %s167_s3 }
  0x2b   : > { %s166_s15 = scalar_lea.hbm %s954_s1, %s488_s28  ;;  %s157_s16 = scalar_lea.sflag [#allocation6], %s835_s25 }
  0x2c   : > { %s643_s0 = scalar_lea.vmem %s168_s3, 1024  ;;  %s748_s30 = smov [#allocation5]  }
  0x2d   : > { %p644_p5 = scmp.ne.s32.totalorder %s168_s3, %s643_s0  ;;  %s648_s4 = sshll.u32 %s748_s30, 4  ;;  %s649_s4 = int_to_ptr.vmem [resolvable:$false] %s648_s4 }
  0x2e   : > { %s650_s6 = scalar_lea.vmem %s649_s4, 2048  ;;  %p651_p7 = scmp.lt.s32.totalorder %s168_s3, %s649_s4 }
  0x2f   : > { %p646_p6 = pnand %p644_p5, %p604_p1  ;;  %p652_p10 = scmp.lt.s32.totalorder %s650_s6, %s643_s0 }
  0x31   : > { %p647_p4 = pneg %p646_p6  ;;  %p653_p13 = por %p652_p10, %p651_p7 }
  0x33   : > { %p654_p2 = pnand %p653_p13, %p647_p4 }
  0x35   : > { %657 = shalt.err (!%p654_p2)
}
  0x36   : > { %530 = dma.hbm_to_vmem [thread:$0]  (!%p844_p0), %s166_s15, 1024, %s168_s3, %s157_s16, %s746_s19, %s746_s19, %s747_s20  }
  0x37   : > { %179 = sbr.rel (%p861_p3) target bundleno = 310 (0x136), region = 28  ;;  %s881_s25 = sand.u32 (!%p861_p3), 1, %s726_s10  }
  0x38   : > { %s472_s18 = sshll.u32 (!%p861_p3), %s881_s25, 3  ;;  %s182_s0 = scalar_lea.sflag (!%p861_p3), [#allocation3], %s881_s25 }
  0x39   : > { %s885_s26 = scalar_lea.vmem (!%p861_p3), [#allocation2], %s472_s18 }
  0x3c   : > { %709 = dma.done.wait (%p817_p8), %s182_s0, 128  }
  0x3d   : > { %711 = vsyncadd (%p817_p8), %s182_s0, 4294967168  ;;  %s473_s5 = sshll.u32 %s881_s25, 6  ;;  %s191_s19 = scalar_lea.sflag [#allocation6], %s881_s25 }
  0x3e   : > { %s194_s20 = scalar_lea.vmem [#allocation5], %s473_s5 }
  0x3f   : > { %713 = dma.done.wait (%p817_p8), %s191_s19, 1024  }
  0x40   : > { %715 = vsyncadd (%p817_p8), %s191_s19, 4294966272  ;;  %v749_v0 = vmov 0.0   ;;  %vm750_vm0 = vmmov 0   ;;  %v593_v1 = vld [vmem:[%s194_s20 + $0x38] sm:$0xff]   ;;  %v594_v2 = vld [vmem:[%s194_s20 + $0x30] sm:$0xff]   ;;  %s474_s21 = sshll.u32 %s881_s25, 4 }
  0x41   : > { %498 = vmatprep.subr.bf16.mxu0 %v749_v0  ;;  %514 = vmatprep.mubr.msk.bf16.mxu0 %vm750_vm0, %v749_v0  ;;  %v595_v3 = vld [vmem:[%s194_s20 + $0x28] sm:$0xff]   ;;  %v596_v4 = vld [vmem:[%s194_s20 + $0x20] sm:$0xff]   ;;  %v597_v5 = vld [vmem:[%s194_s20 + $0x18] sm:$0xff]   ;;  %s219_s27 = scalar_lea.vmem [#allocation7], %s474_s21  ;;  %s485_s29 = sshll.u32 %s734_s12, 7 }
  0x42   : > { %499 = vmatpush3.bf16.msra.mxu0 %v593_v1  ;;  %v598_v6 = vld [vmem:[%s194_s20 + $0x10] sm:$0xff]   ;;  %v599_v7 = vld [vmem:[%s194_s20 + $0x8] sm:$0xff]   ;;  %v600_v8 = vld [vmem:[%s194_s20] sm:$0xff]   ;;  %s354_s28 = sshll.u32 %s219_s27, 4  ;;  %s905_s8 = scalar_lea.hbm %s955_s2, %s485_s29  ;;  %s900_s28 = int_to_ptr.vmem [resolvable:$true] %s354_s28 }
  0x43   : > { %500 = vmatprep.subr.bf16.mxu0 %v749_v0  ;;  %v601_v9 = vld [vmem:[%s885_s26] sm:$0xff]   ;;  %s339_s15 = scalar_lea.sflag [#allocation4], %s881_s25  ;;  %s658_s16 = scalar_lea.vmem %s900_s28, 256 }
  0x44   : > { %p659_p8 = scmp.ne.s32.totalorder %s900_s28, %s658_s16  ;;  %s751_s12 = smov [#allocation7]  }
  0x45   : > { %s662_s30 = sshll.u32 %s751_s12, 4  ;;  %s663_s30 = int_to_ptr.vmem [resolvable:$false] %s662_s30 }
  0x46   : > { %501 = vmatpush3.bf16.msra.mxu0 %v594_v2  ;;  %p660_p0 = pnand %p659_p8, %p821_p9  ;;  %s664_s4 = scalar_lea.vmem %s663_s30, 512 }
  0x47   : > { %502 = vmatprep.subr.bf16.mxu0 %v749_v0  ;;  %p665_p3 = scmp.lt.s32.totalorder %s900_s28, %s663_s30  ;;  %p666_p5 = scmp.lt.s32.totalorder %s664_s4, %s658_s16 }
  0x48   : > { %p661_p1 = pneg %p660_p0 }
  0x49   : > { %p667_p6 = por %p666_p5, %p665_p3 }
  0x4a   : > { %503 = vmatpush3.bf16.msra.mxu0 %v595_v3 }
  0x4b   : > { %504 = vmatprep.subr.bf16.mxu0 %v749_v0  ;;  %p668_p4 = pnand %p667_p6, %p661_p1 }
  0x4e   : > { %505 = vmatpush3.bf16.msra.mxu0 %v596_v4 }
  0x4f   : > { %506 = vmatprep.subr.bf16.mxu0 %v749_v0 }
  0x52   : > { %507 = vmatpush3.bf16.msra.mxu0 %v597_v5 }
  0x53   : > { %508 = vmatprep.subr.bf16.mxu0 %v749_v0 }
  0x56   : > { %509 = vmatpush3.bf16.msra.mxu0 %v598_v6 }
  0x57   : > { %510 = vmatprep.subr.bf16.mxu0 %v749_v0 }
  0x5a   : > { %511 = vmatpush3.bf16.msra.mxu0 %v599_v7 }
  0x5b   : > { %512 = vmatprep.subr.bf16.mxu0 %v749_v0 }
  0x5e   : > { %513 = vmatpush3.bf16.msra.mxu0 %v600_v8 }
  0x61   : > { %515 = vmatmul.mubr.bf16.vlgmr.msra.gmra.mxu0 %v601_v9 }
 0x121   : > { %v329_v10 = vpop.f32.mrf.mxu0 }
 0x122   : > { %336 = vst [vmem:[%s219_s27] sm:$0xff] %v329_v10 }
 0x123   : > { %v516_v11 = vpop.f32.mrf.mxu0 }
 0x125   : > { %v332_v12 = vpop.f32.mrf.mxu0 }
 0x126   : > { %337 = vst [vmem:[%s219_s27 + $0x8] sm:$0xff] %v332_v12 }
 0x127   : > { %v517_v13 = vpop.f32.mrf.mxu0 }
 0x128   : > { %671 = shalt.err (!%p668_p4)
}
 0x129   : > { %s672_s6 = scalar_lea.hbm %s905_s8, 256  ;;  %s676_s26 = scalar_lea.hbm %s955_s2, 512 }
 0x12a   : > { %p673_p7 = scmp.ne.s32.totalorder %s905_s8, %s672_s6  ;;  %p677_p2 = scmp.lt.s32.totalorder %s905_s8, %s955_s2 }
 0x12b   : > { %p678_p8 = scmp.lt.s32.totalorder %s676_s26, %s672_s6 }
 0x12c   : > { %p674_p10 = pnand %p673_p7, %p821_p9 }
 0x12d   : > { %p679_p0 = por %p678_p8, %p677_p2 }
 0x12e   : > { %p675_p13 = pneg %p674_p10 }
 0x130   : > { %p680_p1 = pnand %p679_p0, %p675_p13 }
 0x132   : > { %683 = shalt.err (!%p680_p1)
}
 0x133   : > { %s752_s20 = smov 128   ;;  %s753_s21 = smov 256  }
 0x134   : > { %s754_s27 = smov 8  }
 0x135   : > { %522 = dma.vmem_to_hbm [thread:$0]  (%p821_p9), %s900_s28, 256, %s905_s8, %s339_s15, %s752_s20, %s753_s21, %s754_s27  }
 0x136 PF: > { %s369_s29 = sand.u32 1, %s722_s9   ;;  %p532_p3 = pnand %p465_p12, %p828_p11 }
 0x137   : > { %s370_s3 = scalar_lea.sflag [#allocation4], %s369_s29 }
 0x138   : > { %p533_p5 = pneg %p532_p3 }
 0x13a   : > { %717 = dma.done.wait (%p533_p5), %s370_s3, 256  }
 0x13b   : > { %719 = vsyncadd (%p533_p5), %s370_s3, 4294967040  ;;  %s21_s14 = sadd.s32 1, %s742_s14   ;;  %s964_s9 = smov %s726_s10 }
 0x13c   : > { %p18_p6 = scmp.ge.s32.totalorder %s21_s14, 4   ;;  %s965_s10 = smov %s730_s11 }
 0x13d   : > { %s966_s11 = smov %s826_s23  ;;  %s967_s12 = smov %s738_s13 }
 0x13e   : > { %s968_s13 = smov %s970_s17  ;;  %20 = sbr.rel (!%p18_p6) target bundleno = 10 (0xa), region = 86 }
 0x143   :  { %375 = vsyncpa [#allocation3], 1 }
 0x144   :  { %377 = vsyncpa [#allocation3 + $0x1], 1 }
 0x145   :  { %378 = vsyncpa [#allocation6], 1 }
 0x146   :  { %380 = vsyncpa [#allocation6 + $0x1], 1 }
 0x147   :  { %381 = vsyncpa [#allocation4], 1 }
 0x148   :  { %383 = vsyncpa [#allocation4 + $0x1], 1 }

</bundles_post_ra>
